<compile_context>
chip_gen: v6e
topology: v6e:2x2x1
jax: 0.10.0
libtpu: 0.0.40
codegen_flags: <defaults>
</compile_context>

<pallas_src>
import jax
import jax.numpy as jnp
from jax import lax
from jax.experimental import pallas as pl
from jax.experimental.pallas import tpu as pltpu


def _convt_kernel(p_ref, w_ref, b_ref, o_ref):
    # p_ref: (1, G, CK, NP)   per-group im2col patches for one image
    # w_ref: (G, Cout, CK)    folded per-group weights
    # b_ref: (Cout, 1)        bias
    # o_ref: (1, G, Cout, NP) per-group outputs (NP = Hg*Wg on the lane axis)
    G = w_ref.shape[0]
    b = b_ref[...]                                            # (Cout, 1)
    for g in range(G):                                        # small & static -> unrolled
        acc = jnp.dot(w_ref[g], p_ref[0, g],
                      preferred_element_type=jnp.float32)     # (Cout, NP), lane-dense
        o_ref[0, g] = jnp.maximum(acc + b, 0.0).astype(o_ref.dtype)   # bias + ReLU


def conv_transpose2d_relu(x_nchw, weight, bias, stride, padding):
    """ConvTranspose2d(stride, padding) + ReLU, matching PyTorch semantics.

    x_nchw : (N, Cin, H, W)
    weight : (Cin, Cout, K, K)   -- PyTorch ConvTranspose2d weight layout
    bias   : (Cout,)
    Assumes output_padding=0, dilation=1, groups=1 (as the spec module).
    """
    N, Cin, H, W = x_nchw.shape
    _, Cout, K, _ = weight.shape
    s = int(stride)

    Ho = (H - 1) * s - 2 * padding + K
    Wo = (W - 1) * s - 2 * padding + K

    # Uniform parity groups require these (true for the tested config K=4,s=2,p=1).
    # TODO(synk): general fallback for K % s != 0 or ragged parity-group sizes.
    assert K % s == 0 and Ho % s == 0 and Wo % s == 0 and Ho > 0 and Wo > 0

    Hg, Wg = Ho // s, Wo // s          # per-group output size
    T1 = K // s                        # taps per parity per axis
    G = s * s                          # number of parity groups
    NP = Hg * Wg                       # lane axis of the matmul/output
    CK = Cin * T1 * T1                 # folded contraction depth

    # Static tap tables: output parity r uses kernel taps k with
    # k == (r + padding) (mod s); input offset dh = (r + padding - k) // s.
    taps = []
    for r in range(s):
        taps.append([(k, (r + padding - k) // s)
                     for k in range(K) if (k - (r + padding)) % s == 0])

    all_d = [d for grp in taps for (_, d) in grp]
    pad_t = max(0, -min(all_d))
    pad_b = max(0, (Hg - 1 + max(all_d)) - (H - 1))
    pad_l = max(0, -min(all_d))
    pad_r = max(0, (Wg - 1 + max(all_d)) - (W - 1))

    xp = jnp.pad(x_nchw, ((0, 0), (0, 0), (pad_t, pad_b), (pad_l, pad_r)))

    # Per-group im2col patches (lane-dense: NP on the last axis) and folded weights.
    patch_groups = []
    weight_groups = []
    for rh in range(s):
        for rw in range(s):
            p_slices = []
            w_slices = []
            for (kh, dh) in taps[rh]:
                for (kw, dw) in taps[rw]:
                    oh = dh + pad_t
                    ow = dw + pad_l
                    sl = xp[:, :, oh:oh + Hg, ow:ow + Wg]            # (N, Cin, Hg, Wg)
                    p_slices.append(sl.reshape(N, Cin, NP))
                    w_slices.append(jnp.transpose(weight[:, :, kh, kw], (1, 0)))  # (Cout, Cin)
            patch_groups.append(jnp.concatenate(p_slices, axis=1))   # (N, CK, NP)
            weight_groups.append(jnp.concatenate(w_slices, axis=1))  # (Cout, CK)

    patches = jnp.stack(patch_groups, axis=1)      # (N, G, CK, NP)
    w_fold = jnp.stack(weight_groups, axis=0)      # (G, Cout, CK)
    b2 = bias.reshape(Cout, 1)

    out_grouped = pl.pallas_call(
        _convt_kernel,
        out_shape=jax.ShapeDtypeStruct((N, G, Cout, NP), x_nchw.dtype),
        grid_spec=pltpu.PrefetchScalarGridSpec(
            num_scalar_prefetch=0,
            grid=(N,),
            in_specs=[
                pl.BlockSpec((1, G, CK, NP), lambda n: (n, 0, 0, 0)),
                pl.BlockSpec((G, Cout, CK), lambda n: (0, 0, 0)),
                pl.BlockSpec((Cout, 1), lambda n: (0, 0)),
            ],
            out_specs=pl.BlockSpec((1, G, Cout, NP), lambda n: (n, 0, 0, 0)),
        ),
        compiler_params=pltpu.CompilerParams(
            dimension_semantics=("parallel",)),
    )(patches, w_fold, b2)

    # Depth-to-space: interleave the s*s parity groups back into (N, Cout, Ho, Wo).
    out = out_grouped.reshape(N, s, s, Cout, Hg, Wg)
    out = jnp.transpose(out, (0, 3, 4, 1, 5, 2)).reshape(N, Cout, Ho, Wo)
    return out


def _reference(x_nchw, weight, bias, stride, padding):
    """Pure-JAX reference (independent zero-insertion formulation)."""
    N, Cin, H, W = x_nchw.shape
    _, Cout, K, _ = weight.shape
    x = jnp.transpose(x_nchw, (0, 2, 3, 1))
    Hd, Wd = (H - 1) * stride + 1, (W - 1) * stride + 1
    x_dil = jnp.zeros((N, Hd, Wd, Cin), x.dtype).at[:, ::stride, ::stride, :].set(x)
    pad = K - 1 - padding
    x_pad = jnp.pad(x_dil, ((0, 0), (pad, pad), (pad, pad), (0, 0)))
    w_conv = jnp.transpose(weight[:, :, ::-1, ::-1], (2, 3, 0, 1))
    Ho = (H - 1) * stride - 2 * padding + K
    Wo = (W - 1) * stride - 2 * padding + K
    out = jnp.zeros((N, Ho, Wo, Cout), jnp.float32)
    for kh in range(K):
        for kw in range(K):
            out = out + jnp.einsum(
                'nhwc,cd->nhwd',
                x_pad[:, kh:kh + Ho, kw:kw + Wo, :], w_conv[kh, kw],
                preferred_element_type=jnp.float32)
    out = jnp.maximum(out + bias[None, None, None, :], 0.0)
    return jnp.transpose(out, (0, 3, 1, 2)).astype(x_nchw.dtype)


if __name__ == "__main__":
    # Module config: ConvTranspose2d(in=4, out=8, kernel=4, stride=2, padding=1)
    in_channels, out_channels = 4, 8
    kernel_size, stride, padding = 4, 2, 1

    key = jax.random.PRNGKey(0)
    kx, kw, kb = jax.random.split(key, 3)

    # Deterministic parameter init (PyTorch-style uniform bounds).
    fan_in = out_channels * kernel_size * kernel_size
    bound = 1.0 / (fan_in ** 0.5)
    weight = jax.random.uniform(
        kw, (in_channels, out_channels, kernel_size, kernel_size),
        dtype=jnp.float32, minval=-bound, maxval=bound)
    bias = jax.random.uniform(
        kb, (out_channels,), dtype=jnp.float32, minval=-bound, maxval=bound)

    # Input: (N, C, H, W) = (2, 4, 16, 16)  ->  output (2, 8, 32, 32)
    x = jax.random.normal(kx, (2, in_channels, 16, 16), dtype=jnp.float32)

    out = conv_transpose2d_relu(x, weight, bias, stride, padding)
    out = jax.block_until_ready(out)

    ref = _reference(x, weight, bias, stride, padding)
    assert out.shape == (2, out_channels, 32, 32), out.shape
    assert jnp.allclose(out, ref, atol=1e-4, rtol=1e-4), "mismatch vs reference"

    print("KERNEL_OK")
</pallas_src>

<mosaic_0001>
module attributes {stable_mosaic.version = 11 : i64} {
  func.func @_convt_kernel(%arg0: i32, %arg1: memref<1x4x16x256xf32, #tpu.memory_space<vmem>>, %arg2: memref<4x8x16xf32, #tpu.memory_space<vmem>>, %arg3: memref<8x1xf32, #tpu.memory_space<vmem>>, %arg4: memref<1x4x8x256xf32, #tpu.memory_space<vmem>>) attributes {dimension_semantics = [#tpu.dimension_semantics<parallel>], iteration_bounds = array<i64: 2>, scalar_prefetch = 0 : i64, scratch_operands = 0 : i64, tpu.core_type = #tpu.core_type<tc>, window_params = [{transform_indices = @transform_0, window_bounds = array<i64: 1, 4, 16, 256>}, {pipeline_mode = #tpu.pipeline_mode<synchronous>, transform_indices = @transform_1, window_bounds = array<i64: 4, 8, 16>}, {pipeline_mode = #tpu.pipeline_mode<synchronous>, transform_indices = @transform_2, window_bounds = array<i64: 8, 1>}, {transform_indices = @transform_3, window_bounds = array<i64: 1, 4, 8, 256>}]} {
    %c0 = arith.constant 0 : index
    %c0_0 = arith.constant 0 : index
    %0 = vector.load %arg3[%c0, %c0_0] : memref<8x1xf32, #tpu.memory_space<vmem>>, vector<8x1xf32>
    %c0_1 = arith.constant 0 : index
    %c0_2 = arith.constant 0 : index
    %c0_3 = arith.constant 0 : index
    %1 = vector.load %arg2[%c0_1, %c0_2, %c0_3] : memref<4x8x16xf32, #tpu.memory_space<vmem>>, vector<1x8x16xf32>
    %2 = vector.shape_cast %1 : vector<1x8x16xf32> to vector<8x16xf32>
    %c0_4 = arith.constant 0 : index
    %c0_5 = arith.constant 0 : index
    %c0_6 = arith.constant 0 : index
    %c0_7 = arith.constant 0 : index
    %3 = vector.load %arg1[%c0_4, %c0_5, %c0_6, %c0_7] : memref<1x4x16x256xf32, #tpu.memory_space<vmem>>, vector<1x1x16x256xf32>
    %4 = vector.shape_cast %3 : vector<1x1x16x256xf32> to vector<16x256xf32>
    %cst = arith.constant dense<0.000000e+00> : vector<8x256xf32>
    %5 = tpu.matmul %2, %4, %cst {dimension_numbers = #tpu.dot_dimension_numbers<[1], [0], [0], [1], [0, 0, 1, 1], [], []>} : vector<8x16xf32>, vector<16x256xf32>, vector<8x256xf32> -> vector<8x256xf32>
    %6 = vector.broadcast %0 : vector<8x1xf32> to vector<8x256xf32>
    %7 = arith.addf %5, %6 : vector<8x256xf32>
    %cst_8 = arith.constant 0.000000e+00 : f32
    %8 = vector.broadcast %cst_8 : f32 to vector<8x256xf32>
    %9 = arith.maximumf %7, %8 : vector<8x256xf32>
    %c0_9 = arith.constant 0 : index
    %c0_10 = arith.constant 0 : index
    %c0_11 = arith.constant 0 : index
    %c0_12 = arith.constant 0 : index
    %10 = vector.load %arg4[%c0_9, %c0_10, %c0_11, %c0_12] : memref<1x4x8x256xf32, #tpu.memory_space<vmem>>, vector<1x1x8x256xf32>
    %11 = vector.shape_cast %10 : vector<1x1x8x256xf32> to vector<8x256xf32>
    %12 = vector.shape_cast %9 : vector<8x256xf32> to vector<1x1x8x256xf32>
    tpu.vector_store %arg4[%c0_9, %c0_10, %c0_11, %c0_12], %12 {strides = array<i32>} : memref<1x4x8x256xf32, #tpu.memory_space<vmem>>, vector<1x1x8x256xf32>,
    %c1 = arith.constant 1 : index
    %c0_13 = arith.constant 0 : index
    %c0_14 = arith.constant 0 : index
    %13 = vector.load %arg2[%c1, %c0_13, %c0_14] : memref<4x8x16xf32, #tpu.memory_space<vmem>>, vector<1x8x16xf32>
    %14 = vector.shape_cast %13 : vector<1x8x16xf32> to vector<8x16xf32>
    %c0_15 = arith.constant 0 : index
    %c1_16 = arith.constant 1 : index
    %c0_17 = arith.constant 0 : index
    %c0_18 = arith.constant 0 : index
    %15 = vector.load %arg1[%c0_15, %c1_16, %c0_17, %c0_18] : memref<1x4x16x256xf32, #tpu.memory_space<vmem>>, vector<1x1x16x256xf32>
    %16 = vector.shape_cast %15 : vector<1x1x16x256xf32> to vector<16x256xf32>
    %cst_19 = arith.constant dense<0.000000e+00> : vector<8x256xf32>
    %17 = tpu.matmul %14, %16, %cst_19 {dimension_numbers = #tpu.dot_dimension_numbers<[1], [0], [0], [1], [0, 0, 1, 1], [], []>} : vector<8x16xf32>, vector<16x256xf32>, vector<8x256xf32> -> vector<8x256xf32>
    %18 = vector.broadcast %0 : vector<8x1xf32> to vector<8x256xf32>
    %19 = arith.addf %17, %18 : vector<8x256xf32>
    %cst_20 = arith.constant 0.000000e+00 : f32
    %20 = vector.broadcast %cst_20 : f32 to vector<8x256xf32>
    %21 = arith.maximumf %19, %20 : vector<8x256xf32>
    %c0_21 = arith.constant 0 : index
    %c1_22 = arith.constant 1 : index
    %c0_23 = arith.constant 0 : index
    %c0_24 = arith.constant 0 : index
    %22 = vector.load %arg4[%c0_21, %c1_22, %c0_23, %c0_24] : memref<1x4x8x256xf32, #tpu.memory_space<vmem>>, vector<1x1x8x256xf32>
    %23 = vector.shape_cast %22 : vector<1x1x8x256xf32> to vector<8x256xf32>
    %24 = vector.shape_cast %21 : vector<8x256xf32> to vector<1x1x8x256xf32>
    tpu.vector_store %arg4[%c0_21, %c1_22, %c0_23, %c0_24], %24 {strides = array<i32>} : memref<1x4x8x256xf32, #tpu.memory_space<vmem>>, vector<1x1x8x256xf32>,
    %c2 = arith.constant 2 : index
    %c0_25 = arith.constant 0 : index
    %c0_26 = arith.constant 0 : index
    %25 = vector.load %arg2[%c2, %c0_25, %c0_26] : memref<4x8x16xf32, #tpu.memory_space<vmem>>, vector<1x8x16xf32>
    %26 = vector.shape_cast %25 : vector<1x8x16xf32> to vector<8x16xf32>
    %c0_27 = arith.constant 0 : index
    %c2_28 = arith.constant 2 : index
    %c0_29 = arith.constant 0 : index
    %c0_30 = arith.constant 0 : index
    %27 = vector.load %arg1[%c0_27, %c2_28, %c0_29, %c0_30] : memref<1x4x16x256xf32, #tpu.memory_space<vmem>>, vector<1x1x16x256xf32>
    %28 = vector.shape_cast %27 : vector<1x1x16x256xf32> to vector<16x256xf32>
    %cst_31 = arith.constant dense<0.000000e+00> : vector<8x256xf32>
    %29 = tpu.matmul %26, %28, %cst_31 {dimension_numbers = #tpu.dot_dimension_numbers<[1], [0], [0], [1], [0, 0, 1, 1], [], []>} : vector<8x16xf32>, vector<16x256xf32>, vector<8x256xf32> -> vector<8x256xf32>
    %30 = vector.broadcast %0 : vector<8x1xf32> to vector<8x256xf32>
    %31 = arith.addf %29, %30 : vector<8x256xf32>
    %cst_32 = arith.constant 0.000000e+00 : f32
    %32 = vector.broadcast %cst_32 : f32 to vector<8x256xf32>
    %33 = arith.maximumf %31, %32 : vector<8x256xf32>
    %c0_33 = arith.constant 0 : index
    %c2_34 = arith.constant 2 : index
    %c0_35 = arith.constant 0 : index
    %c0_36 = arith.constant 0 : index
    %34 = vector.load %arg4[%c0_33, %c2_34, %c0_35, %c0_36] : memref<1x4x8x256xf32, #tpu.memory_space<vmem>>, vector<1x1x8x256xf32>
    %35 = vector.shape_cast %34 : vector<1x1x8x256xf32> to vector<8x256xf32>
    %36 = vector.shape_cast %33 : vector<8x256xf32> to vector<1x1x8x256xf32>
    tpu.vector_store %arg4[%c0_33, %c2_34, %c0_35, %c0_36], %36 {strides = array<i32>} : memref<1x4x8x256xf32, #tpu.memory_space<vmem>>, vector<1x1x8x256xf32>,
    %c3 = arith.constant 3 : index
    %c0_37 = arith.constant 0 : index
    %c0_38 = arith.constant 0 : index
    %37 = vector.load %arg2[%c3, %c0_37, %c0_38] : memref<4x8x16xf32, #tpu.memory_space<vmem>>, vector<1x8x16xf32>
    %38 = vector.shape_cast %37 : vector<1x8x16xf32> to vector<8x16xf32>
    %c0_39 = arith.constant 0 : index
    %c3_40 = arith.constant 3 : index
    %c0_41 = arith.constant 0 : index
    %c0_42 = arith.constant 0 : index
    %39 = vector.load %arg1[%c0_39, %c3_40, %c0_41, %c0_42] : memref<1x4x16x256xf32, #tpu.memory_space<vmem>>, vector<1x1x16x256xf32>
    %40 = vector.shape_cast %39 : vector<1x1x16x256xf32> to vector<16x256xf32>
    %cst_43 = arith.constant dense<0.000000e+00> : vector<8x256xf32>
    %41 = tpu.matmul %38, %40, %cst_43 {dimension_numbers = #tpu.dot_dimension_numbers<[1], [0], [0], [1], [0, 0, 1, 1], [], []>} : vector<8x16xf32>, vector<16x256xf32>, vector<8x256xf32> -> vector<8x256xf32>
    %42 = vector.broadcast %0 : vector<8x1xf32> to vector<8x256xf32>
    %43 = arith.addf %41, %42 : vector<8x256xf32>
    %cst_44 = arith.constant 0.000000e+00 : f32
    %44 = vector.broadcast %cst_44 : f32 to vector<8x256xf32>
    %45 = arith.maximumf %43, %44 : vector<8x256xf32>
    %c0_45 = arith.constant 0 : index
    %c3_46 = arith.constant 3 : index
    %c0_47 = arith.constant 0 : index
    %c0_48 = arith.constant 0 : index
    %46 = vector.load %arg4[%c0_45, %c3_46, %c0_47, %c0_48] : memref<1x4x8x256xf32, #tpu.memory_space<vmem>>, vector<1x1x8x256xf32>
    %47 = vector.shape_cast %46 : vector<1x1x8x256xf32> to vector<8x256xf32>
    %48 = vector.shape_cast %45 : vector<8x256xf32> to vector<1x1x8x256xf32>
    tpu.vector_store %arg4[%c0_45, %c3_46, %c0_47, %c0_48], %48 {strides = array<i32>} : memref<1x4x8x256xf32, #tpu.memory_space<vmem>>, vector<1x1x8x256xf32>,
    return
  }
  func.func @transform_0(%arg0: i32) -> (i32, i32, i32, i32) {
    %c0_i32 = arith.constant 0 : i32
    %c0_i32_0 = arith.constant 0 : i32
    %c0_i32_1 = arith.constant 0 : i32
    %c0_i32_2 = arith.constant 0 : i32
    return %arg0, %c0_i32, %c0_i32_0, %c0_i32_1 : i32, i32, i32, i32
  }
  func.func @transform_1(%arg0: i32) -> (i32, i32, i32) {
    %c0_i32 = arith.constant 0 : i32
    %c0_i32_0 = arith.constant 0 : i32
    %c0_i32_1 = arith.constant 0 : i32
    %c0_i32_2 = arith.constant 0 : i32
    return %c0_i32, %c0_i32_0, %c0_i32_1 : i32, i32, i32
  }
  func.func @transform_2(%arg0: i32) -> (i32, i32) {
    %c0_i32 = arith.constant 0 : i32
    %c0_i32_0 = arith.constant 0 : i32
    %c0_i32_1 = arith.constant 0 : i32
    return %c0_i32, %c0_i32_0 : i32, i32
  }
  func.func @transform_3(%arg0: i32) -> (i32, i32, i32, i32) {
    %c0_i32 = arith.constant 0 : i32
    %c0_i32_0 = arith.constant 0 : i32
    %c0_i32_1 = arith.constant 0 : i32
    %c0_i32_2 = arith.constant 0 : i32
    return %arg0, %c0_i32, %c0_i32_0, %c0_i32_1 : i32, i32, i32, i32
  }
}

</mosaic_0001>

<bundles_post_ra>
// kernel: tpu_custom_call.1
= control target key start
LH: loop header
LB: loop body
LE: loop exit
PB: predicated region body
PF: predicated region fallthrough
CT: control target
= control target key end

     0   :  { %8 = vsyncpa [#allocation3], 0  ;;  %s1113_s0 = inlined_call_operand.hbm [shape: f32[2,4,16,256], index: 0, kind: input, shape index: {}]   ;;  %s1114_s1 = inlined_call_operand.hbm [shape: f32[4,8,16], index: 1, kind: input, shape index: {}]   ;;  %s1115_s2 = inlined_call_operand.vmem [shape: f32[8,1], index: 2, kind: input, shape index: {}]   ;;  %s1116_s3 = inlined_call_operand.hbm [shape: f32[2,4,8,256], index: 3, kind: output, shape index: {}]  }
   0x1   :  { %10 = vsyncpa [#allocation3 + $0x1], 0 }
   0x2   :  { %11 = vsyncpa [#allocation6], 0 }
   0x3   :  { %12 = vsyncpa [#allocation4], 0 }
   0x4   :  { %14 = vsyncpa [#allocation4 + $0x1], 0  ;;  %s910_s12 = smov 0   ;;  %s912_s13 = smov 0  }
   0x5   :  { %s914_s14 = smov 0   ;;  %s916_s15 = smov 0  }
   0x6 LB: > { %s931_s16 = sadd.s32 4294967295, %s877_s15   ;;  %s649_s17 = sadd.s32 4294967294, %s877_s15   ;;  %s877_s15 = sphi %s916_s15, %s1138_s15   ;;  %s873_s14 = sphi %s914_s14, %s1137_s14   ;;  %s869_s13 = sphi %s912_s13, %s1136_s13   ;;  %s865_s12 = sphi %s910_s12, %s1135_s12  }
   0x7   : > { %p40_p0 = scmp.ne.s32.totalorder %s869_s13, %s865_s12  ;;  %p1117_p1 = scmp.eq.s32.totalorder %s931_s16, 0 }
   0x8   : > { %p112_p3 = scmp.eq.s32.totalorder %s649_s17, 1  ;;  %p650_p5 = scmp.ge.s32.totalorder %s877_s15, 1 }
   0x9   : > { %p940_p4 = por %p1117_p1, %p40_p0  ;;  %p119_p7 = scmp.lt.s32.totalorder %s877_s15, 3 }
   0xa   : > { %p945_p6 = por %p112_p3, %p40_p0  ;;  %s879_s21 = smov [#allocation5]  }
   0xb   : > { %s1121_s18 = scalar_select %p940_p4, 1, 0 }
   0xc   : > { %s1122_s19 = scalar_select %p945_p6, 1, 0 }
   0xd   : > { %p950_p8 = pnand %p650_p5, %p119_p7  ;;  %s131_s22 = sshll.u32 %s879_s21, 4  ;;  %s132_s22 = int_to_ptr.vmem [resolvable:$true] %s131_s22 }
   0xe   : > { %s964_s24 = sadd.s32 1, %s877_s15   ;;  %s27_s25 = sadd.s32 1, %s873_s14 }
   0xf   : > { %s1123_s20 = scalar_select %p950_p8, 1, 0 }
  0x10   : > { %p697_p9 = pneg %p950_p8  ;;  %s24_s26 = ssub.s32 %s877_s15, %s964_s24 }
  0x11   : > { %s766_s27 = scalar_lea.vmem %s132_s22, 512  ;;  %p774_p5 = scmp.lt.s32.totalorder %s132_s22, %s132_s22 }
  0x12   : > { %p959_p11 = pnand %p697_p9, %p1117_p1  ;;  %p767_p13 = scmp.ne.s32.totalorder %s132_s22, %s766_s27 }
  0x13   : > { %p775_p7 = scmp.lt.s32.totalorder %s766_s27, %s766_s27 }
  0x14   : > { %p757_p12 = pneg %p959_p11 }
  0x15   : > { %p776_p10 = por %p775_p7, %p774_p5 }
  0x16   : > { %p769_p0 = pnand %p767_p13, %p757_p12 }
  0x18   : > { %p770_p3 = pneg %p769_p0 }
  0x1a   : > { %p777_p2 = pnand %p776_p10, %p770_p3 }
  0x1c   : > { %780 = shalt.err (!%p777_p2)
}
  0x1d   : > { %s880_s28 = smov 128   ;;  %s881_s29 = smov 8  }
  0x1e   : > { %700 = dma.hbm_to_vmem [thread:$0]  (!%p959_p11), %s1114_s1, 512, %s132_s22, [#allocation6], %s880_s28, %s880_s28, %s881_s29  }
  0x1f   : > { %p25_p9 = scmp.eq.s32.totalorder %s24_s26, 0  ;;  %p34_p12 = scmp.ne.s32.totalorder %s873_s14, %s869_s13 }
  0x20   : > { %p35_p10 = scmp.eq.s32.totalorder %s877_s15, 0  ;;  %p710_p2 = scmp.lt.s32.totalorder %s877_s15, 2 }
  0x21   : > { %s981_s5 = scalar_select %p25_p9, %s873_s14, %s27_s25  }
  0x22   : > { %p36_p13 = por %p35_p10, %p34_p12  ;;  %p1125_p0 = scmp.eq.s32.totalorder %s931_s16, 1 }
  0x23   : > { %s148_s7 = sand.u32 1, %s873_s14   ;;  %s687_s8 = sshll.u32 %s877_s15, 11 }
  0x24   : > { %p985_p3 = por %p1125_p0, %p34_p12  ;;  %s653_s9 = sshll.u32 %s148_s7, 7 }
  0x25   : > { %s994_s17 = scalar_lea.hbm %s1113_s0, %s687_s8  ;;  %s152_s21 = scalar_lea.vmem [#allocation2], %s653_s9 }
  0x26   : > { %s1126_s6 = scalar_select %p985_p3, 1, 0 }
  0x27   : > { %s159_s22 = sshll.u32 %s152_s21, 4  ;;  %p996_p11 = pnand %p710_p2, %p36_p13  ;;  %s1000_s22 = int_to_ptr.vmem [resolvable:$true] %s159_s22 }
  0x28   : > { %s1002_s25 = scalar_lea.sflag [#allocation3], %s148_s7  ;;  %s781_s26 = scalar_lea.hbm %s994_s17, 2048 }
  0x29   : > { %p782_p5 = scmp.ne.s32.totalorder %s994_s17, %s781_s26  ;;  %p783_p7 = pneg %p996_p11 }
  0x2a   : > { %s786_s29 = scalar_lea.hbm %s1113_s0, 4096  ;;  %p787_p10 = scmp.lt.s32.totalorder %s994_s17, %s1113_s0 }
  0x2b   : > { %p784_p9 = pnand %p783_p7, %p782_p5  ;;  %p788_p2 = scmp.lt.s32.totalorder %s786_s29, %s781_s26 }
  0x2d   : > { %p785_p12 = pneg %p784_p9  ;;  %p789_p13 = por %p788_p2, %p787_p10 }
  0x2f   : > { %p790_p0 = pnand %p789_p13, %p785_p12 }
  0x31   : > { %793 = shalt.err (!%p790_p0)
}
  0x32   : > { %s794_s7 = scalar_lea.vmem %s1000_s22, 2048  ;;  %s882_s8 = smov [#allocation2]  }
  0x33   : > { %p795_p1 = scmp.ne.s32.totalorder %s1000_s22, %s794_s7  ;;  %s799_s9 = sshll.u32 %s882_s8, 4  ;;  %s800_s9 = int_to_ptr.vmem [resolvable:$false] %s799_s9 }
  0x34   : > { %s801_s10 = scalar_lea.vmem %s800_s9, 4096  ;;  %p802_p9 = scmp.lt.s32.totalorder %s1000_s22, %s800_s9 }
  0x35   : > { %p797_p6 = pnand %p795_p1, %p783_p7  ;;  %p803_p3 = scmp.lt.s32.totalorder %s801_s10, %s794_s7 }
  0x37   : > { %p798_p5 = pneg %p797_p6  ;;  %p804_p4 = por %p803_p3, %p802_p9 }
  0x39   : > { %p805_p8 = pnand %p804_p4, %p798_p5 }
  0x3b   : > { %808 = shalt.err (!%p805_p8)
}
  0x3c   : > { %s883_s11 = smov 256   ;;  %s884_s21 = smov 16  }
  0x3d   : > { %704 = dma.hbm_to_vmem [thread:$0]  (!%p996_p11), %s994_s17, 2048, %s1000_s22, %s1002_s25, %s883_s11, %s883_s11, %s884_s21  }
  0x3e   : > { %p1128_p1 = scmp.ne.s32.totalorder %s1123_s20, 0 }
  0x3f   : > { %s1026_s26 = sand.u32 (!%p1128_p1), 1, %s869_s13   ;;  %p1129_p4 = scmp.ne.s32.totalorder (!%p1128_p1), %s1121_s18, 0 }
  0x40   : > { %171 = sbr.rel (%p1128_p1) target bundleno = 299 (0x12b), region = 32  ;;  %s657_s27 = sshll.u32 (!%p1128_p1), %s1026_s26, 7 }
  0x41   : > { %s174_s28 = scalar_lea.sflag (!%p1128_p1), [#allocation3], %s1026_s26  ;;  %s1030_s29 = scalar_lea.vmem (!%p1128_p1), [#allocation2], %s657_s27 }
  0x45   : > { %852 = dma.done.wait (%p1129_p4), %s174_s28, 2048  }
  0x46   : > { %854 = vsyncadd (%p1129_p4), %s174_s28, 4294965248  ;;  %p1130_p6 = scmp.eq.s32.totalorder %s931_s16, 0 }
  0x48   : > { %856 = dma.done.wait (%p1130_p6), [#allocation6], 512   ;;  %p1131_p8 = pmov %p1130_p6 }
  0x49   : > { %v885_v0 = vmov 0.0   ;;  %v886_v1 = vmov 0   ;;  %v209_v2 = vld [vmem:[%s1030_s29 + $0x18] sm:$0xff]  ;;  %v208_v4 = vld [vmem:[%s1030_s29 + $0x10] sm:$0xff]  ;;  %v207_v6 = vld [vmem:[%s1030_s29 + $0x8] sm:$0xff]  ;;  %vm215_vm0 = vcmask 130048  }
  0x4a   : > { %858 = vsyncadd (%p1131_p8), [#allocation6], 4294966784  ;;  %283 = vmatprep.mubr.f32.mxu0 %v885_v0  ;;  %368 = vmatprep.mubr.f32.mxu1 %v885_v0  ;;  %v664_v3 = vld [vmem:[%s1030_s29 + $0x38] sm:$0xff]  ;;  %v663_v5 = vld [vmem:[%s1030_s29 + $0x30] sm:$0xff]  ;;  %s659_s17 = sshll.u32 %s1026_s26, 6  ;;  %s688_s23 = sshll.u32 %s931_s16, 10 }
  0x4b   : > { %754 = vset.pattern.permute.xlu0 %v886_v1  ;;  %247 = vmatprep.subr.mxu0 %v209_v2  ;;  %v662_v7 = vld [vmem:[%s1030_s29 + $0x28] sm:$0xff]  ;;  %v206_v8 = vld [vmem:[%s1030_s29] sm:$0xff]  ;;  %v671_v12 = vld [vmem:[%s1030_s29 + $0x58] sm:$0xff]  ;;  %s203_s22 = scalar_lea.vmem [#allocation7], %s659_s17  ;;  %s1068_s7 = scalar_lea.hbm %s1116_s3, %s688_s23 }
  0x4c   : > { %332 = vmatprep.subr.mxu1 %v664_v3  ;;  %248 = vmatpush1.msra.mxu0 %v208_v4  ;;  %v661_v9 = vld [vmem:[%s1030_s29 + $0x20] sm:$0xff]  ;;  %v295_v11 = vld [vmem:[#allocation5 + $0x8] sm:$0xff]  ;;  %v678_v13 = vld [vmem:[%s1030_s29 + $0x78] sm:$0xff]  ;;  %s566_s25 = sshll.u32 %s203_s22, 4  ;;  %s553_s16 = scalar_lea.sflag [#allocation4], %s1026_s26  ;;  %s1070_s25 = int_to_ptr.vmem [resolvable:$true] %s566_s25 }
  0x4d   : > { %333 = vmatpush1.msra.mxu1 %v663_v5  ;;  %v205_v10 = vld [vmem:[#allocation5] sm:$0xff]  ;;  %249 = vmatprep.subr.mxu0 %v207_v6  ;;  %v670_v14 = vld [vmem:[%s1030_s29 + $0x50] sm:$0xff]  ;;  %v669_v16 = vld [vmem:[%s1030_s29 + $0x48] sm:$0xff]  ;;  %s809_s8 = scalar_lea.vmem %s1070_s25, 1024  ;;  %p1132_p11 = scmp.ne.s32.totalorder %s1126_s6, 0 }
  0x4e   : > { %334 = vmatprep.subr.mxu1 %v662_v7  ;;  %250 = vmatpush1.msra.mxu0 %v206_v8  ;;  %v677_v15 = vld [vmem:[%s1030_s29 + $0x70] sm:$0xff]  ;;  %v676_v17 = vld [vmem:[%s1030_s29 + $0x68] sm:$0xff]  ;;  %v668_v18 = vld [vmem:[%s1030_s29 + $0x40] sm:$0xff]  ;;  %p810_p3 = scmp.ne.s32.totalorder %s1070_s25, %s809_s8  ;;  %s887_s9 = smov [#allocation7]  }
  0x4f   : > { %335 = vmatpush1.msra.mxu1 %v661_v9  ;;  %660 = vmatmul.mubr.msk.f32.vlgmr.msra.gmra.mxu0 %vm215_vm0, %v205_v10  ;;  %v675_v19 = vld [vmem:[%s1030_s29 + $0x60] sm:$0xff]  ;;  %v381_v20 = vld [vmem:[#allocation5 + $0x10] sm:$0xff]  ;;  %v467_v21 = vld [vmem:[#allocation5 + $0x18] sm:$0xff]  ;;  %s813_s10 = sshll.u32 %s887_s9, 4  ;;  %s814_s10 = int_to_ptr.vmem [resolvable:$false] %s813_s10 }
  0x50   : > { %665 = vmatmul.mubr.msk.f32.vlgmr.msra.gmra.mxu1 %vm215_vm0, %v295_v11  ;;  %418 = vmatprep.subr.mxu0 %v671_v12  ;;  %v204_v22 = vld [vmem:[%s1115_s2] sm:$0xff]  ;;  %p811_p7 = pnand %p810_p3, %p1132_p11  ;;  %s815_s11 = scalar_lea.vmem %s814_s10, 2048 }
  0x51   : > { %504 = vmatprep.subr.mxu1 %v678_v13  ;;  %419 = vmatpush1.msra.mxu0 %v670_v14  ;;  %p816_p10 = scmp.lt.s32.totalorder %s1070_s25, %s814_s10  ;;  %p817_p2 = scmp.lt.s32.totalorder %s815_s11, %s809_s8 }
  0x52   : > { %505 = vmatpush1.msra.mxu1 %v677_v15  ;;  %420 = vmatprep.subr.mxu0 %v669_v16  ;;  %p812_p12 = pneg %p811_p7 }
  0x53   : > { %506 = vmatprep.subr.mxu1 %v676_v17  ;;  %421 = vmatpush1.msra.mxu0 %v668_v18  ;;  %p818_p13 = por %p817_p2, %p816_p10 }
  0x54   : > { %454 = vmatprep.mubr.f32.mxu0 %v885_v0  ;;  %507 = vmatpush1.msra.mxu1 %v675_v19 }
  0x55   : > { %540 = vmatprep.mubr.f32.mxu1 %v885_v0  ;;  %672 = vmatmul.mubr.msk.f32.vlgmr.msra.gmra.mxu0 %vm215_vm0, %v381_v20  ;;  %p819_p0 = pnand %p818_p13, %p812_p12 }
  0x56   : > { %679 = vmatmul.mubr.msk.f32.vlgmr.msra.gmra.mxu1 %vm215_vm0, %v467_v21  ;;  %212 = vperm.xlu0 %754, %v204_v22  }
  0xd1   : > { %v213_v23 = vpop.permute.xlu0 %212 }
 0x10f   : > { %v285_v24 = vpop.f32.mrf.mxu0 }
 0x110   : > { %v370_v25 = vpop.f32.mrf.mxu1  ;;  %v286_v26 = vadd.f32 %v285_v24, %v213_v23 }
 0x111   : > { %v371_v27 = vadd.f32 %v370_v25, %v213_v23  ;;  %v287_v28 = vpop.f32.mrf.mxu0 }
 0x112   : > { %v372_v29 = vpop.f32.mrf.mxu1  ;;  %v290_v30 = vmax.f32 %v286_v26, 0.0  ;;  %v288_v32 = vadd.f32 %v287_v28, %v213_v23 }
 0x113   : > { %v375_v31 = vmax.f32 %v371_v27, 0.0  ;;  %v373_v33 = vadd.f32 %v372_v29, %v213_v23 }
 0x114   : > { %292 = vst [vmem:[%s203_s22] sm:$0xff] %v290_v30  ;;  %v291_v34 = vmax.f32 %v288_v32, 0.0 }
 0x115   : > { %666 = vst [vmem:[%s203_s22 + $0x10] sm:$0xff] %v375_v31  ;;  %v376_v35 = vmax.f32 %v373_v33, 0.0  ;;  %v456_v36 = vpop.f32.mrf.mxu0 }
 0x116   : > { %v542_v37 = vpop.f32.mrf.mxu1  ;;  %293 = vst [vmem:[%s203_s22 + $0x8] sm:$0xff] %v291_v34  ;;  %v457_v38 = vadd.f32 %v456_v36, %v213_v23 }
 0x117   : > { %667 = vst [vmem:[%s203_s22 + $0x18] sm:$0xff] %v376_v35  ;;  %v543_v39 = vadd.f32 %v542_v37, %v213_v23  ;;  %v458_v40 = vpop.f32.mrf.mxu0 }
 0x118   : > { %v544_v41 = vpop.f32.mrf.mxu1  ;;  %v461_v42 = vmax.f32 %v457_v38, 0.0  ;;  %v459_v44 = vadd.f32 %v458_v40, %v213_v23 }
 0x119   : > { %v547_v43 = vmax.f32 %v543_v39, 0.0  ;;  %v545_v45 = vadd.f32 %v544_v41, %v213_v23 }
 0x11a   : > { %673 = vst [vmem:[%s203_s22 + $0x20] sm:$0xff] %v461_v42  ;;  %v462_v46 = vmax.f32 %v459_v44, 0.0 }
 0x11b   : > { %680 = vst [vmem:[%s203_s22 + $0x30] sm:$0xff] %v547_v43  ;;  %v548_v47 = vmax.f32 %v545_v45, 0.0 }
 0x11c   : > { %674 = vst [vmem:[%s203_s22 + $0x28] sm:$0xff] %v462_v46 }
 0x11d   : > { %681 = vst [vmem:[%s203_s22 + $0x38] sm:$0xff] %v548_v47 }
 0x11e   : > { %822 = shalt.err (!%p819_p0)
}
 0x11f   : > { %s823_s21 = scalar_lea.hbm %s1068_s7, 1024  ;;  %s827_s29 = scalar_lea.hbm %s1116_s3, 2048 }
 0x120   : > { %p824_p5 = scmp.ne.s32.totalorder %s1068_s7, %s823_s21  ;;  %p828_p4 = scmp.lt.s32.totalorder %s1068_s7, %s1116_s3 }
 0x121   : > { %p829_p6 = scmp.lt.s32.totalorder %s827_s29, %s823_s21 }
 0x122   : > { %p825_p9 = pnand %p824_p5, %p1132_p11 }
 0x123   : > { %p830_p8 = por %p829_p6, %p828_p4 }
 0x124   : > { %p826_p1 = pneg %p825_p9 }
 0x126   : > { %p831_p3 = pnand %p830_p8, %p826_p1 }
 0x128   : > { %834 = shalt.err (!%p831_p3)
}
 0x129   : > { %s888_s17 = smov 256   ;;  %s889_s22 = smov 16  }
 0x12a   : > { %695 = dma.vmem_to_hbm [thread:$0]  (%p1132_p11), %s1070_s25, 1024, %s1068_s7, %s553_s16, %s888_s17, %s888_s17, %s889_s22  }
 0x12b PF: > { %s581_s23 = sand.u32 1, %s865_s12   ;;  %p1133_p7 = scmp.ne.s32.totalorder %s1122_s19, 0 }
 0x12c   : > { %p1134_p12 = scmp.ge.s32.totalorder %s877_s15, 2  ;;  %s582_s30 = scalar_lea.sflag [#allocation4], %s581_s23 }
 0x12e   : > { %p706_p10 = pnand %p1134_p12, %p1133_p7 }
 0x130   : > { %p707_p2 = pneg %p706_p10 }
 0x132   : > { %860 = dma.done.wait (%p707_p2), %s582_s30, 1024  }
 0x133   : > { %862 = vsyncadd (%p707_p2), %s582_s30, 4294966272  ;;  %p17_p13 = scmp.ge.s32.totalorder %s964_s24, 4   ;;  %s1135_s12 = smov %s869_s13 }
 0x134   : > { %s1136_s13 = smov %s873_s14  ;;  %s1137_s14 = smov %s981_s5 }
 0x135   : > { %s1138_s15 = smov %s964_s24  ;;  %19 = sbr.rel (!%p17_p13) target bundleno = 6 (0x6), region = 90 }
 0x13a   :  { %587 = vsyncpa [#allocation3], 1 }
 0x13b   :  { %589 = vsyncpa [#allocation3 + $0x1], 1 }
 0x13c   :  { %590 = vsyncpa [#allocation6], 1 }
 0x13d   :  { %591 = vsyncpa [#allocation4], 1 }
 0x13e   :  { %593 = vsyncpa [#allocation4 + $0x1], 1 }

</bundles_post_ra>
